<compile_context>
chip_gen: v5e
topology: v5e:2x2
jax: 0.10.0
libtpu: 0.0.40
codegen_flags: <defaults>
</compile_context>

<pallas_src>
import math

import jax
import jax.numpy as jnp
from jax.experimental import pallas as pl
from jax.experimental.pallas import tpu as pltpu


# ------------------------------ helpers --------------------------------------
def _round_up(x, m):
    return ((x + m - 1) // m) * m


def _choose_fold(K, N, itemsize, max_weight_bytes=8 * 1024 * 1024):
    """Smallest fold s.t. fold*N is a multiple of 128 (lane-dense output)."""
    fold = math.lcm(N, 128) // N
    # Guard: don't let the block-diagonal weight blow up VMEM for huge K.
    if fold * K * fold * N * itemsize > max_weight_bytes:
        return 1
    return fold


# ----------------------------- Pallas kernel ---------------------------------
def _patch_embed_kernel(x_ref, w_ref, b_ref, o_ref):
    # x_ref: (TM, FOLD*K) folded patch tile (streamed, double-buffered)
    # w_ref: (FOLD*K, FOLD*N) block-diagonal weight (VMEM resident)
    # b_ref: (1, FOLD*N) tiled bias (VMEM resident, f32)
    # o_ref: (TM, FOLD*N) lane-dense output tile
    acc = jnp.dot(x_ref[...], w_ref[...], preferred_element_type=jnp.float32)
    o_ref[...] = (acc + b_ref[...]).astype(o_ref.dtype)


def patch_embed_matmul(patches, weight, bias, *, fold, block_rows=512):
    """patches: (M, K), weight: (K, N), bias: (N,) f32  ->  (M, N) f32."""
    M, K = patches.shape
    N = weight.shape[1]

    # Pad M so it folds evenly (no-op for the default sizes).
    m_pad = _round_up(M, fold)
    if m_pad != M:
        patches = jnp.pad(patches, ((0, m_pad - M), (0, 0)))
    m_f = m_pad // fold
    fk, fn = fold * K, fold * N

    # Free reshape (row-major) + tiny block-diagonal weight / tiled bias.
    x_f = patches.reshape(m_f, fk)
    eye = jnp.eye(fold, dtype=weight.dtype)
    w_f = jnp.einsum("pq,kn->pkqn", eye, weight).reshape(fk, fn)
    b_f = jnp.tile(bias.astype(jnp.float32), fold).reshape(1, fn)

    # M tile: multiple of 8 sublanes (or the full dim when tiny).
    if m_f <= 8:
        tm = m_f
    else:
        tm = min(block_rows, _round_up(m_f, 8))
    grid = (pl.cdiv(m_f, tm),)

    out_f = pl.pallas_call(
        _patch_embed_kernel,
        out_shape=jax.ShapeDtypeStruct((m_f, fn), jnp.float32),
        grid=grid,
        in_specs=[
            pl.BlockSpec((tm, fk), lambda i: (i, 0)),   # streamed patch tiles
            pl.BlockSpec((fk, fn), lambda i: (0, 0)),   # resident weight
            pl.BlockSpec((1, fn), lambda i: (0, 0)),    # resident bias
        ],
        out_specs=pl.BlockSpec((tm, fn), lambda i: (i, 0)),
        compiler_params=pltpu.CompilerParams(
            dimension_semantics=("parallel",),          # shard across TCs (v7x)
            vmem_limit_bytes=32 * 1024 * 1024,
            # Let XLA fuse the patch reshape/transpose into this input's DMA
            # instead of materializing the patch matrix in HBM.
            allow_input_fusion=[True, False, False],
        ),
    )(x_f, w_f, b_f)

    out = out_f.reshape(m_pad, N)
    return out[:M] if m_pad != M else out


# ------------------------------ Module wrapper --------------------------------
class TokenLearnerLocalPallas:
    def __init__(self, img_size=(4, 8, 8), patch_size=(2, 2, 2),
                 in_chans=1, embed_dim=8, key=None,
                 compute_dtype=jnp.float32):
        self.img_size = img_size
        self.patch_size = patch_size
        self.in_chans = in_chans
        self.embed_dim = embed_dim
        self.compute_dtype = compute_dtype
        self.num_patches = (img_size[0] // patch_size[0]) * \
                           (img_size[1] // patch_size[1]) * \
                           (img_size[2] // patch_size[2])

        if key is None:
            key = jax.random.PRNGKey(0)
        kw, kb = jax.random.split(key)
        pd, ph, pw = patch_size
        fan_in = in_chans * pd * ph * pw
        bound = 1.0 / (fan_in ** 0.5)
        # Conv3d weight: (embed_dim, in_chans, pd, ph, pw), bias: (embed_dim,)
        self.proj_weight = jax.random.uniform(
            kw, (embed_dim, in_chans, pd, ph, pw),
            minval=-bound, maxval=bound, dtype=jnp.float32)
        self.proj_bias = jax.random.uniform(
            kb, (embed_dim,), minval=-bound, maxval=bound, dtype=jnp.float32)
        # NOTE: self.map_in exists in the PyTorch __init__ but is unused in
        # forward, so it is intentionally not materialized here.

    def __call__(self, x):
        # x: (B, C, D, H, W) NCDHW, same as PyTorch.
        B, C, D, H, W = x.shape
        pd, ph, pw = self.patch_size
        Dp, Hp, Wp = D // pd, H // ph, W // pw
        M = B * Dp * Hp * Wp
        K = C * pd * ph * pw

        # Cast first so the glue transpose moves half the bytes in bf16 mode.
        xc = x.astype(self.compute_dtype)
        # Extract non-overlapping patches, flatten each in (c, kd, kh, kw) order
        # (matches Conv3d weight layout); patch-row order = (b, d', h', w'),
        # identical to PyTorch's flatten(2).transpose(1, 2).
        xp = xc.reshape(B, C, Dp, pd, Hp, ph, Wp, pw)
        xp = xp.transpose(0, 2, 4, 6, 1, 3, 5, 7)
        patches = xp.reshape(M, K)

        w2d = self.proj_weight.reshape(self.embed_dim, K).T.astype(self.compute_dtype)

        fold = _choose_fold(K, self.embed_dim,
                            jnp.dtype(self.compute_dtype).itemsize)
        out = patch_embed_matmul(patches, w2d, self.proj_bias, fold=fold)
        return out.reshape(B, Dp * Hp * Wp, self.embed_dim)


# ------------------------------- reference ------------------------------------
def _reference_forward(module, x):
    # Pure-JAX f32 reference: Conv3d (stride == kernel) via conv_general_dilated.
    out = jax.lax.conv_general_dilated(
        x.astype(jnp.float32),
        module.proj_weight,
        window_strides=module.patch_size,
        padding="VALID",
        dimension_numbers=("NCDHW", "OIDHW", "NCDHW"),
    )
    out = out + module.proj_bias.reshape(1, -1, 1, 1, 1)
    B, E = out.shape[0], out.shape[1]
    out = out.reshape(B, E, -1)           # flatten(2)
    return jnp.transpose(out, (0, 2, 1))  # transpose(1, 2)


if __name__ == "__main__":
    key = jax.random.PRNGKey(0)
    k_x, k_p = jax.random.split(key)

    img_size = (4, 8, 8)
    patch_size = (2, 2, 2)
    in_chans = 1
    embed_dim = 8
    B = 2

    x = jax.random.normal(k_x, (B, in_chans) + img_size, dtype=jnp.float32)

    # --- f32 path (tight numerical check) ---
    mod32 = TokenLearnerLocalPallas(img_size, patch_size, in_chans, embed_dim,
                                    key=k_p, compute_dtype=jnp.float32)
    out32 = jax.block_until_ready(jax.jit(lambda v: mod32(v))(x))
    ref = jax.block_until_ready(_reference_forward(mod32, x))
    assert out32.shape == (B, mod32.num_patches, embed_dim), out32.shape
    assert jnp.allclose(out32, ref, atol=1e-5, rtol=1e-5), \
        float(jnp.max(jnp.abs(out32 - ref)))

    # --- bf16-input path (halves HBM traffic; f32 accumulation) ---
    mod16 = TokenLearnerLocalPallas(img_size, patch_size, in_chans, embed_dim,
                                    key=k_p, compute_dtype=jnp.bfloat16)
    out16 = jax.block_until_ready(jax.jit(lambda v: mod16(v))(x))
    assert out16.shape == (B, mod16.num_patches, embed_dim), out16.shape
    assert jnp.allclose(out16, ref, atol=5e-2, rtol=5e-2), \
        float(jnp.max(jnp.abs(out16 - ref)))

    print("KERNEL_OK")
</pallas_src>

<mosaic_0001>
module attributes {stable_mosaic.version = 11 : i64} {
  func.func @_patch_embed_kernel(%arg0: i32, %arg1: memref<4x128xf32, #tpu.memory_space<vmem>>, %arg2: memref<128x128xf32, #tpu.memory_space<vmem>>, %arg3: memref<1x128xf32, #tpu.memory_space<vmem>>, %arg4: memref<4x128xf32, #tpu.memory_space<vmem>>) attributes {dimension_semantics = [#tpu.dimension_semantics<parallel>], iteration_bounds = array<i64: 1>, scalar_prefetch = 0 : i64, scratch_operands = 0 : i64, tpu.core_type = #tpu.core_type<tc>, window_params = [{transform_indices = @transform_0, window_bounds = array<i64: 4, 128>}, {pipeline_mode = #tpu.pipeline_mode<synchronous>, transform_indices = @transform_1, window_bounds = array<i64: 128, 128>}, {pipeline_mode = #tpu.pipeline_mode<synchronous>, transform_indices = @transform_2, window_bounds = array<i64: 1, 128>}, {transform_indices = @transform_3, window_bounds = array<i64: 4, 128>}]} {
    %c0 = arith.constant 0 : index
    %c0_0 = arith.constant 0 : index
    %0 = vector.load %arg1[%c0, %c0_0] : memref<4x128xf32, #tpu.memory_space<vmem>>, vector<4x128xf32>
    %c0_1 = arith.constant 0 : index
    %c0_2 = arith.constant 0 : index
    %1 = vector.load %arg2[%c0_1, %c0_2] : memref<128x128xf32, #tpu.memory_space<vmem>>, vector<128x128xf32>
    %cst = arith.constant dense<0.000000e+00> : vector<4x128xf32>
    %2 = tpu.matmul %0, %1, %cst {dimension_numbers = #tpu.dot_dimension_numbers<[1], [0], [0], [1], [0, 0, 1, 1], [], []>} : vector<4x128xf32>, vector<128x128xf32>, vector<4x128xf32> -> vector<4x128xf32>
    %c0_3 = arith.constant 0 : index
    %c0_4 = arith.constant 0 : index
    %3 = vector.load %arg3[%c0_3, %c0_4] : memref<1x128xf32, #tpu.memory_space<vmem>>, vector<1x128xf32>
    %4 = vector.broadcast %3 : vector<1x128xf32> to vector<4x128xf32>
    %5 = arith.addf %2, %4 : vector<4x128xf32>
    %c0_5 = arith.constant 0 : index
    %c0_6 = arith.constant 0 : index
    %6 = vector.load %arg4[%c0_5, %c0_6] : memref<4x128xf32, #tpu.memory_space<vmem>>, vector<4x128xf32>
    tpu.vector_store %arg4[%c0_5, %c0_6], %5 {strides = array<i32>} : memref<4x128xf32, #tpu.memory_space<vmem>>, vector<4x128xf32>,
    return
  }
  func.func @transform_0(%arg0: i32) -> (i32, i32) {
    %c0_i32 = arith.constant 0 : i32
    %c0_i32_0 = arith.constant 0 : i32
    return %arg0, %c0_i32 : i32, i32
  }
  func.func @transform_1(%arg0: i32) -> (i32, i32) {
    %c0_i32 = arith.constant 0 : i32
    %c0_i32_0 = arith.constant 0 : i32
    %c0_i32_1 = arith.constant 0 : i32
    return %c0_i32, %c0_i32_0 : i32, i32
  }
  func.func @transform_2(%arg0: i32) -> (i32, i32) {
    %c0_i32 = arith.constant 0 : i32
    %c0_i32_0 = arith.constant 0 : i32
    %c0_i32_1 = arith.constant 0 : i32
    return %c0_i32, %c0_i32_0 : i32, i32
  }
  func.func @transform_3(%arg0: i32) -> (i32, i32) {
    %c0_i32 = arith.constant 0 : i32
    %c0_i32_0 = arith.constant 0 : i32
    return %arg0, %c0_i32 : i32, i32
  }
}

</mosaic_0001>

<bundles_post_ra>
// kernel: tile.6
= control target key start
LH: loop header
LB: loop body
LE: loop exit
PB: predicated region body
PF: predicated region fallthrough
CT: control target
= control target key end

     0   :  { %s28_s0 = inlined_call_operand.vmem [shape: f32[8], index: 0, kind: input, shape index: {}]   ;;  %s29_s1 = inlined_call_operand.vmem [shape: f32[16,8], index: 1, kind: output, shape index: {}]  }
   0x1   :  { %v4_v0 = vld [vmem:[%s28_s0] ss:$0 sm:$0xff] }
   0x2   :  { %5 = vst [vmem:[%s29_s1] sm:$0xff] %v4_v0 }
   0x3   :  { %8 = vst [vmem:[%s29_s1 + $0x8] sm:$0xff] %v4_v0 }

// kernel: tile.7
= control target key start
LH: loop header
LB: loop body
LE: loop exit
PB: predicated region body
PF: predicated region fallthrough
CT: control target
= control target key end

     0   :  { %s131_s10 = smov 120   ;;  %s132_s11 = smov 104   ;;  %vm3_vm0 = vcmask 64512   ;;  %vm9_vm1 = vcmask 1048512   ;;  %vm15_vm2 = vcmask 982912   ;;  %vm21_vm3 = vcmask 917312   ;;  %s207_s0 = inlined_call_operand.vmem [shape: f32[16,8], index: 0, kind: input, shape index: {}]   ;;  %s208_s1 = inlined_call_operand.vmem [shape: f32[1,128], index: 1, kind: output, shape index: {}]  }
   0x1   :  { %v101_v0 = vld [vmem:[%s207_s0 + $0xf] sm:$0x1]   ;;  %v103_v1 = vld [vmem:[%s207_s0 + $0xd] sm:$0x1]   ;;  %v105_v2 = vld [vmem:[%s207_s0 + $0xb] sm:$0x1]  }
   0x2   :  { %7 = vrot.lane.b32.xlu0 %v101_v0, %s131_s10  ;;  %19 = vrot.lane.b32.xlu1 %v103_v1, %s132_s11  ;;  %s133_s14 = smov 88   ;;  %v102_v3 = vld [vmem:[%s207_s0 + $0xe] sm:$0x1]   ;;  %v104_v4 = vld [vmem:[%s207_s0 + $0xc] sm:$0x1]   ;;  %s134_s19 = smov 112  }
   0x3   :  { %31 = vrot.lane.b32.xlu2 %v105_v2, %s133_s14  ;;  %s135_s20 = smov 96   ;;  %v106_v5 = vld [vmem:[%s207_s0 + $0xa] sm:$0x1]   ;;  %s136_s23 = smov 80   ;;  %v107_v6 = vld [vmem:[%s207_s0 + $0x9] sm:$0x1]  }
   0x4   :  { %v108_v7 = vld [vmem:[%s207_s0 + $0x8] sm:$0x1]   ;;  %s137_s28 = smov 72   ;;  %s138_s29 = smov 64   ;;  %v109_v8 = vld [vmem:[%s207_s0 + $0x7] sm:$0x1]  }
   0x5   :  { %s139_s3 = smov 56   ;;  %v110_v9 = vld [vmem:[%s207_s0 + $0x6] sm:$0x1]   ;;  %v111_v10 = vld [vmem:[%s207_s0 + $0x5] sm:$0x1]   ;;  %s140_s8 = smov 48  }
   0x6   :  { %s141_s9 = smov 40   ;;  %v112_v11 = vld [vmem:[%s207_s0 + $0x4] sm:$0x1]   ;;  %s142_s12 = smov 32   ;;  %v113_v12 = vld [vmem:[%s207_s0 + $0x3] sm:$0x1]  }
   0x7   :  { %v114_v13 = vld [vmem:[%s207_s0 + $0x2] sm:$0x1]   ;;  %s143_s17 = smov 24   ;;  %s144_s18 = smov 16   ;;  %v115_v14 = vld [vmem:[%s207_s0 + $0x1] sm:$0x1]  }
   0x8   :  { %s145_s21 = smov 8   ;;  %v2_v15 = vld [vmem:[%s207_s0] sm:$0x1]   ;;  %vm27_vm4 = vcmask 851712   ;;  %vm33_vm5 = vcmask 786112   ;;  %vm39_vm6 = vcmask 720512  }
   0x9   :  { %4 = vst.msk [vmem:[#allocation0] sm:$0x1] %vm3_vm0, %v2_v15   ;;  %vm45_vm7 = vcmask 654912   ;;  %vm51_vm8 = vcmask 589312   ;;  %vm57_vm9 = vcmask 523712   ;;  %vm63_vm10 = vcmask 458112  }
   0xa   :  { %13 = vrot.lane.b32.xlu0 %v102_v3, %s134_s19  ;;  %25 = vrot.lane.b32.xlu1 %v104_v4, %s135_s20  ;;  %vm69_vm11 = vcmask 392512   ;;  %vm75_vm12 = vcmask 326912   ;;  %vm81_vm13 = vcmask 261312   ;;  %vm87_vm14 = vcmask 195712  }
   0xb   :  { %37 = vrot.lane.b32.xlu2 %v106_v5, %s136_s23  ;;  %vm93_vm15 = vcmask 130112  }
  0x12   :  { %43 = vrot.lane.b32.xlu0 %v107_v6, %s137_s28  ;;  %49 = vrot.lane.b32.xlu1 %v108_v7, %s138_s29 }
  0x13   :  { %55 = vrot.lane.b32.xlu2 %v109_v8, %s139_s3 }
  0x1a   :  { %61 = vrot.lane.b32.xlu0 %v110_v9, %s140_s8  ;;  %67 = vrot.lane.b32.xlu1 %v111_v10, %s141_s9 }
  0x1b   :  { %73 = vrot.lane.b32.xlu2 %v112_v11, %s142_s12 }
  0x22   :  { %79 = vrot.lane.b32.xlu0 %v113_v12, %s143_s17  ;;  %85 = vrot.lane.b32.xlu1 %v114_v13, %s144_s18 }
  0x23   :  { %91 = vrot.lane.b32.xlu2 %v115_v14, %s145_s21 }
  0x5d   :  { %v32_v16 = vpop.permute.xlu2 %31  }
  0x65   :  { %v38_v17 = vpop.permute.xlu2 %37  }
  0x6d   :  { %v56_v18 = vpop.permute.xlu2 %55  }
  0x74   :  { %v8_v19 = vpop.permute.xlu0 %7   ;;  %v20_v20 = vpop.permute.xlu1 %19  }
  0x75   :  { %10 = vst.msk [vmem:[#allocation0] sm:$0x1] %vm9_vm1, %v8_v19   ;;  %v74_v21 = vpop.permute.xlu2 %73  }
  0x7c   :  { %v14_v22 = vpop.permute.xlu0 %13   ;;  %v26_v23 = vpop.permute.xlu1 %25  }
  0x7d   :  { %16 = vst.msk [vmem:[#allocation0] sm:$0x1] %vm15_vm2, %v14_v22   ;;  %v92_v24 = vpop.permute.xlu2 %91  }
  0x7e   :  { %22 = vst.msk [vmem:[#allocation0] sm:$0x1] %vm21_vm3, %v20_v20  }
  0x7f   :  { %28 = vst.msk [vmem:[#allocation0] sm:$0x1] %vm27_vm4, %v26_v23  }
  0x80   :  { %34 = vst.msk [vmem:[#allocation0] sm:$0x1] %vm33_vm5, %v32_v16  }
  0x81   :  { %40 = vst.msk [vmem:[#allocation0] sm:$0x1] %vm39_vm6, %v38_v17  }
  0x84   :  { %v44_v25 = vpop.permute.xlu0 %43   ;;  %v50_v26 = vpop.permute.xlu1 %49  }
  0x85   :  { %46 = vst.msk [vmem:[#allocation0] sm:$0x1] %vm45_vm7, %v44_v25  }
  0x86   :  { %52 = vst.msk [vmem:[#allocation0] sm:$0x1] %vm51_vm8, %v50_v26  }
  0x87   :  { %58 = vst.msk [vmem:[#allocation0] sm:$0x1] %vm57_vm9, %v56_v18  }
  0x8c   :  { %v62_v27 = vpop.permute.xlu0 %61   ;;  %v68_v28 = vpop.permute.xlu1 %67  }
  0x8d   :  { %64 = vst.msk [vmem:[#allocation0] sm:$0x1] %vm63_vm10, %v62_v27  }
  0x8e   :  { %70 = vst.msk [vmem:[#allocation0] sm:$0x1] %vm69_vm11, %v68_v28  }
  0x8f   :  { %76 = vst.msk [vmem:[#allocation0] sm:$0x1] %vm75_vm12, %v74_v21  }
  0x94   :  { %v80_v29 = vpop.permute.xlu0 %79   ;;  %v86_v30 = vpop.permute.xlu1 %85  }
  0x95   :  { %82 = vst.msk [vmem:[#allocation0] sm:$0x1] %vm81_vm13, %v80_v29  }
  0x96   :  { %88 = vst.msk [vmem:[#allocation0] sm:$0x1] %vm87_vm14, %v86_v30  }
  0x97   :  { %94 = vst.msk [vmem:[#allocation0] sm:$0x1] %vm93_vm15, %v92_v24  }
  0x9e   :  { %v97_v31 = vld [vmem:[#allocation0] sm:$0x1] }
  0x9f   :  { %100 = vst [vmem:[%s208_s1] sm:$0x1] %v97_v31 }

// kernel: _lambda_.1
= control target key start
LH: loop header
LB: loop body
LE: loop exit
PB: predicated region body
PF: predicated region fallthrough
CT: control target
= control target key end

     0   :  { %s138_s1 = inlined_call_operand.vmem [shape: f32[128,128], index: 1, kind: input, shape index: {}]   ;;  %s139_s2 = inlined_call_operand.vmem [shape: f32[1,128], index: 2, kind: input, shape index: {}]   ;;  %s140_s0 = inlined_call_operand.vmem [shape: f32[4,128], index: 0, kind: input, shape index: {}]   ;;  %s141_s3 = inlined_call_operand.vmem [shape: f32[4,128], index: 3, kind: output, shape index: {}]  }
   0x1   :  { %v30_v0 = vld [vmem:[%s138_s1 + $0x78] sm:$0xff]  ;;  %v29_v1 = vld [vmem:[%s138_s1 + $0x70] sm:$0xff]  ;;  %v28_v2 = vld [vmem:[%s138_s1 + $0x68] sm:$0xff] }
   0x2   :  { %35 = vmatpush.msra.mxu0 %v30_v0  ;;  %v27_v3 = vld [vmem:[%s138_s1 + $0x60] sm:$0xff]  ;;  %v26_v4 = vld [vmem:[%s138_s1 + $0x58] sm:$0xff]  ;;  %v25_v5 = vld [vmem:[%s138_s1 + $0x50] sm:$0xff] }
   0x3   :  { %v24_v6 = vld [vmem:[%s138_s1 + $0x48] sm:$0xff]  ;;  %v23_v7 = vld [vmem:[%s138_s1 + $0x40] sm:$0xff]  ;;  %v22_v8 = vld [vmem:[%s138_s1 + $0x38] sm:$0xff] }
   0x4   :  { %36 = vmatpush.msra.mxu0 %v29_v1  ;;  %v21_v9 = vld [vmem:[%s138_s1 + $0x30] sm:$0xff]  ;;  %v20_v10 = vld [vmem:[%s138_s1 + $0x28] sm:$0xff]  ;;  %v19_v11 = vld [vmem:[%s138_s1 + $0x20] sm:$0xff] }
   0x5   :  { %v18_v12 = vld [vmem:[%s138_s1 + $0x18] sm:$0xff]  ;;  %v17_v13 = vld [vmem:[%s138_s1 + $0x10] sm:$0xff]  ;;  %v16_v14 = vld [vmem:[%s138_s1 + $0x8] sm:$0xff] }
   0x6   :  { %37 = vmatpush.msra.mxu0 %v28_v2  ;;  %v15_v15 = vld [vmem:[%s138_s1] sm:$0xff] }
   0x7   :  { %v14_v16 = vld [vmem:[%s140_s0] sm:$0xf] }
   0x8   :  { %38 = vmatpush.msra.mxu0 %v27_v3  ;;  %v60_v17 = vld [vmem:[%s139_s2] ss:$0 sm:$0xff] }
   0xa   :  { %39 = vmatpush.msra.mxu0 %v26_v4 }
   0xc   :  { %40 = vmatpush.msra.mxu0 %v25_v5 }
   0xe   :  { %41 = vmatpush.msra.mxu0 %v24_v6 }
  0x10   :  { %42 = vmatpush.msra.mxu0 %v23_v7 }
  0x12   :  { %43 = vmatpush.msra.mxu0 %v22_v8 }
  0x14   :  { %44 = vmatpush.msra.mxu0 %v21_v9 }
  0x16   :  { %45 = vmatpush.msra.mxu0 %v20_v10 }
  0x18   :  { %46 = vmatpush.msra.mxu0 %v19_v11 }
  0x1a   :  { %47 = vmatpush.msra.mxu0 %v18_v12 }
  0x1c   :  { %48 = vmatpush.msra.mxu0 %v17_v13 }
  0x1e   :  { %49 = vmatpush.msra.mxu0 %v16_v14 }
  0x20   :  { %50 = vmatpush.msra.mxu0 %v15_v15 }
  0x21   :  { %51 = vmatmul.f32.vlgmr.msra.gmra.mxu0 %v14_v16 }
  0x9e   :  { %v52_v18 = vpop.f32.mrf.mxu0 }
  0x9f   :  { %v53_v19 = vadd.f32 %v60_v17, %v52_v18 }
  0xa1   :  { %55 = vst [vmem:[%s141_s3] sm:$0xf] %v53_v19 }

</bundles_post_ra>
